<compile_context>
chip_gen: v7x
topology: tpu7x:2x2x1
jax: 0.10.0
libtpu: 0.0.40
codegen_flags: <defaults>
</compile_context>

<pallas_src>
import functools

import jax
import jax.numpy as jnp
import numpy as np
from jax.experimental import pallas as pl
from jax.experimental.pallas import tpu as pltpu


# ------------------------------ small helpers -------------------------------

def _choose_tile_m(m, target):
    """Whole row extent if it fits one block, else `target` rows (mult. of 16)."""
    m = max(int(m), 1)
    return m if m <= target else int(target)


def _choose_tile_n(n, target):
    """Up-proj output-column tile: full width if small, else `target` lanes."""
    n = int(n)
    return n if n <= target else int(target)


def _tpu_vmem_capacity_bytes():
    """Physical VMEM per TensorCore, or None if it cannot be queried."""
    try:
        info = pltpu.get_tpu_info()
        cap = getattr(info, "vmem_capacity_bytes", None)
        if cap:
            return int(cap)
    except Exception:
        pass
    return None


@functools.lru_cache(maxsize=1)
def _buffered_supported():
    """Probe once whether BlockSpec(pipeline_mode=pl.Buffered(1)) lowers here."""
    if not hasattr(pl, "Buffered"):
        return False

    def _copy(x_ref, o_ref):
        o_ref[...] = x_ref[...]

    try:
        fn = pl.pallas_call(
            _copy,
            out_shape=jax.ShapeDtypeStruct((8, 128), jnp.float32),
            grid=(1,),
            in_specs=[pl.BlockSpec((8, 128), lambda i: (0, 0),
                                   pipeline_mode=pl.Buffered(1))],
            out_specs=pl.BlockSpec((8, 128), lambda i: (0, 0)),
        )
        jax.block_until_ready(fn(jnp.zeros((8, 128), jnp.float32)))
        return True
    except Exception:
        return False


def _const_index_map(grid_rank, ndim):
    zeros = (0,) * ndim
    if grid_rank == 1:
        return lambda i: zeros
    return lambda i, j: zeros


def _resident_spec(shape, grid_rank, use_buffered):
    """Whole-array block with a constant index: VMEM-resident, no re-DMA.

    With pl.Buffered(1) the (possibly large) resident operand is also not
    double-buffered, halving its VMEM footprint (matters on v7x's 64 MiB)."""
    idx = _const_index_map(grid_rank, len(shape))
    if use_buffered:
        return pl.BlockSpec(shape, idx, pipeline_mode=pl.Buffered(1))
    return pl.BlockSpec(shape, idx)


def _compiler_params(dim_sems, vmem_limit_bytes):
    return pltpu.CompilerParams(
        dimension_semantics=dim_sems,
        vmem_limit_bytes=vmem_limit_bytes,
    )


# ------------------------------- Pallas kernels ------------------------------

def _fused_dkv_up_kernel(h_ref, wd_ref, bd_ref, wkv_ref, bkv_ref, c_ref, kv_ref):
    """Grid (i, j): i = token-row tile, j = up-proj output-column tile.

    j == 0:  c = h @ W_DKV + b_DKV          (f32 acc, one cast to cache dtype)
    all  j:  kv_j = c @ W_UKV_j + b_UKV_j   (f32 acc, single wide lane-dense store)
    c lives in the grid-resident c output block, so it is computed once per row
    tile and reused for every column tile without an HBM round-trip."""
    @pl.when(pl.program_id(1) == 0)
    def _():
        c_acc = jnp.dot(h_ref[...], wd_ref[...],
                        preferred_element_type=jnp.float32) + bd_ref[...]
        c_ref[...] = c_acc.astype(c_ref.dtype)

    kv_acc = jnp.dot(c_ref[...], wkv_ref[...],
                     preferred_element_type=jnp.float32) + bkv_ref[...]
    kv_ref[...] = kv_acc.astype(kv_ref.dtype)


def _down_proj_kernel(h_ref, wd_ref, bd_ref, c_ref):
    c_acc = jnp.dot(h_ref[...], wd_ref[...],
                    preferred_element_type=jnp.float32) + bd_ref[...]
    c_ref[...] = c_acc.astype(c_ref.dtype)


def _up_proj_kernel(c_ref, wkv_ref, bkv_ref, kv_ref):
    kv_acc = jnp.dot(c_ref[...], wkv_ref[...],
                     preferred_element_type=jnp.float32) + bkv_ref[...]
    kv_ref[...] = kv_acc.astype(kv_ref.dtype)


# -------------------------------- JAX wrappers --------------------------------

def fused_latent_kv_proj(h2d, w_dkv, b_dkv, w_ukv, b_ukv, *, tile_m, tile_n,
                         vmem_limit_bytes, use_buffered):
    """h2d (M, d_model) -> (c (M, L), kv (M, d_k + d_v)). Fused down+up proj."""
    M, Dm = h2d.shape
    L = w_dkv.shape[1]
    Dkv = w_ukv.shape[1]
    dtype = h2d.dtype

    tm = _choose_tile_m(M, tile_m)
    tn = _choose_tile_n(Dkv, tile_n)
    grid = (pl.cdiv(M, tm), pl.cdiv(Dkv, tn))

    if grid[1] == 1:
        wkv_spec = _resident_spec((L, Dkv), 2, use_buffered)
        bkv_spec = _resident_spec((1, Dkv), 2, use_buffered)
    else:
        wkv_spec = pl.BlockSpec((L, tn), lambda i, j: (0, j))
        bkv_spec = pl.BlockSpec((1, tn), lambda i, j: (0, j))

    itemsize = jnp.dtype(dtype).itemsize
    flops = 2 * M * Dm * L + 2 * M * L * Dkv
    bytes_accessed = (itemsize * (M * Dm + M * L + M * Dkv + Dm * L + L * Dkv)
                      + 4 * (L + Dkv))

    c, kv = pl.pallas_call(
        _fused_dkv_up_kernel,
        out_shape=(
            jax.ShapeDtypeStruct((M, L), dtype),
            jax.ShapeDtypeStruct((M, Dkv), dtype),
        ),
        grid=grid,
        in_specs=[
            pl.BlockSpec((tm, Dm), lambda i, j: (i, 0)),
            _resident_spec((Dm, L), 2, use_buffered),
            _resident_spec((1, L), 2, use_buffered),
            wkv_spec,
            bkv_spec,
        ],
        out_specs=(
            pl.BlockSpec((tm, L), lambda i, j: (i, 0)),
            pl.BlockSpec((tm, tn), lambda i, j: (i, j)),
        ),
        compiler_params=_compiler_params(("parallel", "arbitrary"),
                                         vmem_limit_bytes),
        cost_estimate=pl.CostEstimate(flops=flops, transcendentals=0,
                                      bytes_accessed=bytes_accessed),
    )(h2d, w_dkv, b_dkv, w_ukv, b_ukv)
    return c, kv


def latent_down_proj(h2d, w_dkv, b_dkv, *, tile_m, vmem_limit_bytes,
                     use_buffered):
    """h2d (M, d_model) -> c (M, L)."""
    M, Dm = h2d.shape
    L = w_dkv.shape[1]
    dtype = h2d.dtype
    tm = _choose_tile_m(M, tile_m)
    grid = (pl.cdiv(M, tm),)
    itemsize = jnp.dtype(dtype).itemsize

    return pl.pallas_call(
        _down_proj_kernel,
        out_shape=jax.ShapeDtypeStruct((M, L), dtype),
        grid=grid,
        in_specs=[
            pl.BlockSpec((tm, Dm), lambda i: (i, 0)),
            _resident_spec((Dm, L), 1, use_buffered),
            _resident_spec((1, L), 1, use_buffered),
        ],
        out_specs=pl.BlockSpec((tm, L), lambda i: (i, 0)),
        compiler_params=_compiler_params(("parallel",), vmem_limit_bytes),
        cost_estimate=pl.CostEstimate(
            flops=2 * M * Dm * L, transcendentals=0,
            bytes_accessed=itemsize * (M * Dm + M * L + Dm * L) + 4 * L),
    )(h2d, w_dkv, b_dkv)


def latent_up_proj(c2d, w_ukv, b_ukv, *, tile_m, tile_n, vmem_limit_bytes,
                   use_buffered):
    """c2d (M, L) -> kv (M, d_k + d_v). Both grid axes independent -> parallel."""
    M, L = c2d.shape
    Dkv = w_ukv.shape[1]
    dtype = c2d.dtype
    tm = _choose_tile_m(M, tile_m)
    tn = _choose_tile_n(Dkv, tile_n)
    grid = (pl.cdiv(M, tm), pl.cdiv(Dkv, tn))

    if grid[1] == 1:
        wkv_spec = _resident_spec((L, Dkv), 2, use_buffered)
        bkv_spec = _resident_spec((1, Dkv), 2, use_buffered)
    else:
        wkv_spec = pl.BlockSpec((L, tn), lambda i, j: (0, j))
        bkv_spec = pl.BlockSpec((1, tn), lambda i, j: (0, j))

    itemsize = jnp.dtype(dtype).itemsize
    return pl.pallas_call(
        _up_proj_kernel,
        out_shape=jax.ShapeDtypeStruct((M, Dkv), dtype),
        grid=grid,
        in_specs=[
            pl.BlockSpec((tm, L), lambda i, j: (i, 0)),
            wkv_spec,
            bkv_spec,
        ],
        out_specs=pl.BlockSpec((tm, tn), lambda i, j: (i, j)),
        compiler_params=_compiler_params(("parallel", "parallel"),
                                         vmem_limit_bytes),
        cost_estimate=pl.CostEstimate(
            flops=2 * M * L * Dkv, transcendentals=0,
            bytes_accessed=itemsize * (M * L + M * Dkv + L * Dkv) + 4 * Dkv),
    )(c2d, w_ukv, b_ukv)


# ------------------------------ LatentKVAttention -----------------------------

class LatentKVAttentionPallas:
    """JAX/Pallas port of the PyTorch LatentKVAttention forward pass."""

    def __init__(self, params, *, compute_dtype=None, tile_m=None, tile_n=512):
        cap = _tpu_vmem_capacity_bytes()
        if tile_m is None:
            # 512-row tiles on 128-MiB VMEM parts (v5e/v6e), 256 on v7x (64 MiB).
            tile_m = 512 if (cap is not None and cap >= 96 * 1024 * 1024) else 256
        # ~3/4 of physical VMEM leaves headroom for scratch; None -> compiler default.
        self.vmem_limit_bytes = (cap * 3 // 4) if cap is not None else None
        self.use_buffered = _buffered_supported()

        dtype = (jnp.dtype(compute_dtype) if compute_dtype is not None
                 else jnp.dtype(params["w_dkv"].dtype))
        self.dtype = dtype

        # Weights are stored pre-transposed as (in, out); K/V up-projections are
        # fused along the output dim. NOTE: at production sizes keep d_latent /
        # d_k / d_v multiples of 128 lanes (standard MLA dims already are) so
        # every store stays lane-dense.
        self.w_dkv = params["w_dkv"].astype(dtype)
        self.w_ukv = jnp.concatenate([params["w_uk"], params["w_uv"]],
                                     axis=1).astype(dtype)
        # Biases stay f32: they are added to the f32 accumulator before the cast.
        self.b_dkv = params["b_dkv"].astype(jnp.float32).reshape(1, -1)
        self.b_ukv = jnp.concatenate(
            [params["b_uk"], params["b_uv"]], axis=0
        ).astype(jnp.float32).reshape(1, -1)

        self.d_latent = int(params["w_dkv"].shape[1])
        self.d_k = int(params["w_uk"].shape[1])
        self.d_v = int(params["w_uv"].shape[1])
        self.tile_m = int(tile_m)
        self.tile_n = int(tile_n)

    def _split_kv(self, kv2d, B, S):
        k = kv2d[:, :self.d_k].reshape(B, S, self.d_k)
        v = kv2d[:, self.d_k:].reshape(B, S, self.d_v)
        return k, v

    @functools.partial(jax.jit, static_argnums=0)
    def _forward_no_cache(self, h):
        B, S, Dm = h.shape
        h2d = h.reshape(B * S, Dm).astype(self.dtype)
        c2d, kv2d = fused_latent_kv_proj(
            h2d, self.w_dkv, self.b_dkv, self.w_ukv, self.b_ukv,
            tile_m=self.tile_m, tile_n=self.tile_n,
            vmem_limit_bytes=self.vmem_limit_bytes,
            use_buffered=self.use_buffered)
        k, v = self._split_kv(kv2d, B, S)
        return k, v, c2d.reshape(B, S, self.d_latent)

    @functools.partial(jax.jit, static_argnums=0)
    def _forward_with_cache(self, h, latent_kv_cache):
        B, S, Dm = h.shape
        h2d = h.reshape(B * S, Dm).astype(self.dtype)
        # Down-project only the NEW tokens.
        c_new = latent_down_proj(
            h2d, self.w_dkv, self.b_dkv,
            tile_m=self.tile_m, vmem_limit_bytes=self.vmem_limit_bytes,
            use_buffered=self.use_buffered).reshape(B, S, self.d_latent)
        # Seq-axis concat matching torch.cat(..., dim=-2); the full latent cache
        # is a module output, so this copy is required by the API as-is.
        # TODO(synk): preallocated cache slab + lax.dynamic_update_slice once a
        # cache capacity is carried in the API (removes the growing copy).
        c_kv = jnp.concatenate([latent_kv_cache.astype(self.dtype), c_new],
                               axis=-2)
        Bc, St, L = c_kv.shape
        # ONE up-projection over the whole latent sequence: W_UKV loaded into
        # VMEM once, k/v produced contiguous (no per-segment concats).
        kv2d = latent_up_proj(
            c_kv.reshape(Bc * St, L), self.w_ukv, self.b_ukv,
            tile_m=self.tile_m, tile_n=self.tile_n,
            vmem_limit_bytes=self.vmem_limit_bytes,
            use_buffered=self.use_buffered)
        k, v = self._split_kv(kv2d, Bc, St)
        return k, v, c_kv

    def __call__(self, h, latent_kv_cache=None):
        if latent_kv_cache is None:
            return self._forward_no_cache(h)
        return self._forward_with_cache(h, latent_kv_cache)


# ----------------------------------- main ------------------------------------

def _init_linear_params(key, d_in, d_out, dtype=jnp.float32):
    # nn.Linear default init: U(-1/sqrt(in), 1/sqrt(in)) for weight and bias.
    kw, kb = jax.random.split(key)
    bound = 1.0 / np.sqrt(d_in)
    w = jax.random.uniform(kw, (d_in, d_out), dtype, -bound, bound)  # (in, out)
    b = jax.random.uniform(kb, (d_out,), dtype, -bound, bound)
    return w, b


def _reference(h, params, latent_kv_cache=None, compute_dtype=jnp.float32):
    """Pure-JAX mirror of the PyTorch module with the kernels' dtype structure
    (inputs/weights in compute_dtype, f32 accumulation + f32 bias, one cast)."""
    f32 = jnp.float32
    w_dkv = params["w_dkv"].astype(compute_dtype).astype(f32)
    w_uk = params["w_uk"].astype(compute_dtype).astype(f32)
    w_uv = params["w_uv"].astype(compute_dtype).astype(f32)
    b_dkv = params["b_dkv"].astype(f32)
    b_uk = params["b_uk"].astype(f32)
    b_uv = params["b_uv"].astype(f32)
    h32 = h.astype(compute_dtype).astype(f32)
    c_new = (h32 @ w_dkv + b_dkv).astype(compute_dtype)
    if latent_kv_cache is None:
        c_kv = c_new
    else:
        c_kv = jnp.concatenate(
            [latent_kv_cache.astype(compute_dtype), c_new], axis=-2)
    c32 = c_kv.astype(f32)
    k = (c32 @ w_uk + b_uk).astype(compute_dtype)
    v = (c32 @ w_uv + b_uv).astype(compute_dtype)
    return k, v, c_kv


def _assert_close(x, y, rtol, atol):
    np.testing.assert_allclose(
        np.asarray(jnp.asarray(x, jnp.float32)),
        np.asarray(jnp.asarray(y, jnp.float32)),
        rtol=rtol, atol=atol)


if __name__ == "__main__":
    # Small shapes consistent with the module: h is [B, S, d_model].
    B, S, d_model = 2, 8, 32
    d_latent, d_k, d_v = 16, 32, 32

    root = jax.random.PRNGKey(0)
    k_h, k_h2, k_dkv, k_uk, k_uv = jax.random.split(root, 5)

    h = jax.random.normal(k_h, (B, S, d_model), jnp.float32)
    h_step2 = jax.random.normal(k_h2, (B, 5, d_model), jnp.float32)  # odd length

    w_dkv, b_dkv = _init_linear_params(k_dkv, d_model, d_latent)
    w_uk, b_uk = _init_linear_params(k_uk, d_latent, d_k)
    w_uv, b_uv = _init_linear_params(k_uv, d_latent, d_v)
    params = dict(w_dkv=w_dkv, b_dkv=b_dkv, w_uk=w_uk, b_uk=b_uk,
                  w_uv=w_uv, b_uv=b_uv)

    # ---- float32 module: tight check vs the plain-JAX reference -------------
    attn = LatentKVAttentionPallas(params)  # compute dtype = param dtype (f32)

    k1, v1, cache1 = attn(h, latent_kv_cache=None)
    jax.block_until_ready((k1, v1, cache1))
    k2, v2, cache2 = attn(h, latent_kv_cache=cache1)
    jax.block_until_ready((k2, v2, cache2))
    k3, v3, cache3 = attn(h_step2, latent_kv_cache=cache2)  # odd token count
    jax.block_until_ready((k3, v3, cache3))

    rk1, rv1, rc1 = _reference(h, params, None)
    rk2, rv2, rc2 = _reference(h, params, rc1)
    rk3, rv3, rc3 = _reference(h_step2, params, rc2)
    for got, want in [(k1, rk1), (v1, rv1), (cache1, rc1),
                      (k2, rk2), (v2, rv2), (cache2, rc2),
                      (k3, rk3), (v3, rv3), (cache3, rc3)]:
        _assert_close(got, want, rtol=1e-5, atol=1e-5)

    assert cache2.shape == (B, 2 * S, d_latent)
    assert k2.shape == (B, 2 * S, d_k) and v2.shape == (B, 2 * S, d_v)
    assert cache3.shape == (B, 2 * S + 5, d_latent)
    assert k3.shape == (B, 2 * S + 5, d_k) and v3.shape == (B, 2 * S + 5, d_v)

    # ---- bfloat16 module: MXU-native fast path, looser tolerance ------------
    attn_bf16 = LatentKVAttentionPallas(params, compute_dtype=jnp.bfloat16)
    kb1, vb1, cb1 = attn_bf16(h, latent_kv_cache=None)
    jax.block_until_ready((kb1, vb1, cb1))
    kb2, vb2, cb2 = attn_bf16(h, latent_kv_cache=cb1)
    jax.block_until_ready((kb2, vb2, cb2))

    bk1, bv1, bc1 = _reference(h, params, None, compute_dtype=jnp.bfloat16)
    bk2, bv2, bc2 = _reference(h, params, bc1, compute_dtype=jnp.bfloat16)
    for got, want in [(kb1, bk1), (vb1, bv1), (cb1, bc1),
                      (kb2, bk2), (vb2, bv2), (cb2, bc2)]:
        _assert_close(got, want, rtol=5e-2, atol=5e-2)

    assert cb2.dtype == jnp.bfloat16 and kb2.dtype == jnp.bfloat16
    assert cb2.shape == (B, 2 * S, d_latent)

    print("KERNEL_OK")
</pallas_src>

<mosaic_0001>
module attributes {stable_mosaic.version = 11 : i64} {
  func.func @_copy(%arg0: i32, %arg1: memref<8x128xf32, #tpu.memory_space<vmem>>, %arg2: memref<8x128xf32, #tpu.memory_space<vmem>>) attributes {dimension_semantics = [#tpu.dimension_semantics<arbitrary>], iteration_bounds = array<i64: 1>, scalar_prefetch = 0 : i64, scratch_operands = 0 : i64, tpu.core_type = #tpu.core_type<tc>, window_params = [{pipeline_mode = #tpu.pipeline_mode<synchronous>, transform_indices = @transform_0, window_bounds = array<i64: 8, 128>}, {pipeline_mode = #tpu.pipeline_mode<synchronous>, transform_indices = @transform_1, window_bounds = array<i64: 8, 128>}]} {
    %c0 = arith.constant 0 : index
    %c0_0 = arith.constant 0 : index
    %0 = vector.load %arg1[%c0, %c0_0] : memref<8x128xf32, #tpu.memory_space<vmem>>, vector<8x128xf32>
    %c0_1 = arith.constant 0 : index
    %c0_2 = arith.constant 0 : index
    %1 = vector.load %arg2[%c0_1, %c0_2] : memref<8x128xf32, #tpu.memory_space<vmem>>, vector<8x128xf32>
    tpu.vector_store %arg2[%c0_1, %c0_2], %0 {strides = array<i32>} : memref<8x128xf32, #tpu.memory_space<vmem>>, vector<8x128xf32>,
    return
  }
  func.func @transform_0(%arg0: i32) -> (i32, i32) {
    %c0_i32 = arith.constant 0 : i32
    %c0_i32_0 = arith.constant 0 : i32
    %c0_i32_1 = arith.constant 0 : i32
    return %c0_i32, %c0_i32_0 : i32, i32
  }
  func.func @transform_1(%arg0: i32) -> (i32, i32) {
    %c0_i32 = arith.constant 0 : i32
    %c0_i32_0 = arith.constant 0 : i32
    %c0_i32_1 = arith.constant 0 : i32
    return %c0_i32, %c0_i32_0 : i32, i32
  }
}

module attributes {stable_mosaic.version = 11 : i64} {
  func.func @_fused_dkv_up_kernel(%arg0: i32, %arg1: i32, %arg2: memref<16x32xf32, #tpu.memory_space<vmem>>, %arg3: memref<32x16xf32, #tpu.memory_space<vmem>>, %arg4: memref<1x16xf32, #tpu.memory_space<vmem>>, %arg5: memref<16x64xf32, #tpu.memory_space<vmem>>, %arg6: memref<1x64xf32, #tpu.memory_space<vmem>>, %arg7: memref<16x16xf32, #tpu.memory_space<vmem>>, %arg8: memref<16x64xf32, #tpu.memory_space<vmem>>) attributes {dimension_semantics = [#tpu.dimension_semantics<parallel>, #tpu.dimension_semantics<arbitrary>], iteration_bounds = array<i64: 1, 1>, scalar_prefetch = 0 : i64, scratch_operands = 0 : i64, tpu.core_type = #tpu.core_type<tc>, window_params = [{transform_indices = @transform_0, window_bounds = array<i64: 16, 32>}, {pipeline_mode = #tpu.pipeline_mode<synchronous>, transform_indices = @transform_1, window_bounds = array<i64: 32, 16>}, {pipeline_mode = #tpu.pipeline_mode<synchronous>, transform_indices = @transform_2, window_bounds = array<i64: 1, 16>}, {pipeline_mode = #tpu.pipeline_mode<synchronous>, transform_indices = @transform_3, window_bounds = array<i64: 16, 64>}, {pipeline_mode = #tpu.pipeline_mode<synchronous>, transform_indices = @transform_4, window_bounds = array<i64: 1, 64>}, {transform_indices = @transform_5, window_bounds = array<i64: 16, 16>}, {transform_indices = @transform_6, window_bounds = array<i64: 16, 64>}]} {
    %c0_i32 = arith.constant 0 : i32
    %0 = arith.cmpi eq, %arg1, %c0_i32 : i32
    %1 = arith.extui %0 : i1 to i32
    %c0_i32_0 = arith.constant 0 : i32
    %2 = arith.cmpi ne, %1, %c0_i32_0 : i32
    scf.if %2 {
      %c0_8 = arith.constant 0 : index
      %c0_9 = arith.constant 0 : index
      %10 = vector.load %arg2[%c0_8, %c0_9] : memref<16x32xf32, #tpu.memory_space<vmem>>, vector<16x32xf32>
      %c0_10 = arith.constant 0 : index
      %c0_11 = arith.constant 0 : index
      %11 = vector.load %arg3[%c0_10, %c0_11] : memref<32x16xf32, #tpu.memory_space<vmem>>, vector<32x16xf32>
      %cst_12 = arith.constant dense<0.000000e+00> : vector<16x16xf32>
      %12 = tpu.matmul %10, %11, %cst_12 {dimension_numbers = #tpu.dot_dimension_numbers<[1], [0], [0], [1], [0, 0, 1, 1], [], []>} : vector<16x32xf32>, vector<32x16xf32>, vector<16x16xf32> -> vector<16x16xf32>
      %c0_13 = arith.constant 0 : index
      %c0_14 = arith.constant 0 : index
      %13 = vector.load %arg4[%c0_13, %c0_14] : memref<1x16xf32, #tpu.memory_space<vmem>>, vector<1x16xf32>
      %14 = vector.broadcast %13 : vector<1x16xf32> to vector<16x16xf32>
      %15 = arith.addf %12, %14 : vector<16x16xf32>
      %c0_15 = arith.constant 0 : index
      %c0_16 = arith.constant 0 : index
      %16 = vector.load %arg7[%c0_15, %c0_16] : memref<16x16xf32, #tpu.memory_space<vmem>>, vector<16x16xf32>
      tpu.vector_store %arg7[%c0_15, %c0_16], %15 {strides = array<i32>} : memref<16x16xf32, #tpu.memory_space<vmem>>, vector<16x16xf32>,
    } else {
    }
    %c0 = arith.constant 0 : index
    %c0_1 = arith.constant 0 : index
    %3 = vector.load %arg7[%c0, %c0_1] : memref<16x16xf32, #tpu.memory_space<vmem>>, vector<16x16xf32>
    %c0_2 = arith.constant 0 : index
    %c0_3 = arith.constant 0 : index
    %4 = vector.load %arg5[%c0_2, %c0_3] : memref<16x64xf32, #tpu.memory_space<vmem>>, vector<16x64xf32>
    %cst = arith.constant dense<0.000000e+00> : vector<16x64xf32>
    %5 = tpu.matmul %3, %4, %cst {dimension_numbers = #tpu.dot_dimension_numbers<[1], [0], [0], [1], [0, 0, 1, 1], [], []>} : vector<16x16xf32>, vector<16x64xf32>, vector<16x64xf32> -> vector<16x64xf32>
    %c0_4 = arith.constant 0 : index
    %c0_5 = arith.constant 0 : index
    %6 = vector.load %arg6[%c0_4, %c0_5] : memref<1x64xf32, #tpu.memory_space<vmem>>, vector<1x64xf32>
    %7 = vector.broadcast %6 : vector<1x64xf32> to vector<16x64xf32>
    %8 = arith.addf %5, %7 : vector<16x64xf32>
    %c0_6 = arith.constant 0 : index
    %c0_7 = arith.constant 0 : index
    %9 = vector.load %arg8[%c0_6, %c0_7] : memref<16x64xf32, #tpu.memory_space<vmem>>, vector<16x64xf32>
    tpu.vector_store %arg8[%c0_6, %c0_7], %8 {strides = array<i32>} : memref<16x64xf32, #tpu.memory_space<vmem>>, vector<16x64xf32>,
    return
  }
  func.func @transform_0(%arg0: i32, %arg1: i32) -> (i32, i32) {
    %c0_i32 = arith.constant 0 : i32
    %c0_i32_0 = arith.constant 0 : i32
    return %arg0, %c0_i32 : i32, i32
  }
  func.func @transform_1(%arg0: i32, %arg1: i32) -> (i32, i32) {
    %c0_i32 = arith.constant 0 : i32
    %c0_i32_0 = arith.constant 0 : i32
    %c0_i32_1 = arith.constant 0 : i32
    return %c0_i32, %c0_i32_0 : i32, i32
  }
  func.func @transform_2(%arg0: i32, %arg1: i32) -> (i32, i32) {
    %c0_i32 = arith.constant 0 : i32
    %c0_i32_0 = arith.constant 0 : i32
    %c0_i32_1 = arith.constant 0 : i32
    return %c0_i32, %c0_i32_0 : i32, i32
  }
  func.func @transform_3(%arg0: i32, %arg1: i32) -> (i32, i32) {
    %c0_i32 = arith.constant 0 : i32
    %c0_i32_0 = arith.constant 0 : i32
    %c0_i32_1 = arith.constant 0 : i32
    return %c0_i32, %c0_i32_0 : i32, i32
  }
  func.func @transform_4(%arg0: i32, %arg1: i32) -> (i32, i32) {
    %c0_i32 = arith.constant 0 : i32
    %c0_i32_0 = arith.constant 0 : i32
    %c0_i32_1 = arith.constant 0 : i32
    return %c0_i32, %c0_i32_0 : i32, i32
  }
  func.func @transform_5(%arg0: i32, %arg1: i32) -> (i32, i32) {
    %c0_i32 = arith.constant 0 : i32
    %c0_i32_0 = arith.constant 0 : i32
    return %arg0, %c0_i32 : i32, i32
  }
  func.func @transform_6(%arg0: i32, %arg1: i32) -> (i32, i32) {
    %c0_i32 = arith.constant 0 : i32
    return %arg0, %arg1 : i32, i32
  }
}

</mosaic_0001>

<bundles_post_ra>
// kernel: tpu_custom_call.1
= control target key start
LH: loop header
LB: loop body
LE: loop exit
PB: predicated region body
PF: predicated region fallthrough
CT: control target
= control target key end

     0   :  { %6 = vsyncpa [#allocation3], 0  ;;  %s124_s0 = inlined_call_operand.hbm [shape: f32[8,128], index: 0, kind: input, shape index: {}]   ;;  %s125_s1 = inlined_call_operand.hbm [shape: f32[8,128], index: 1, kind: output, shape index: {}]  }
   0x1   :  { %7 = vsyncpa [#allocation4], 0  ;;  %s88_s6 = smov [#allocation2]   ;;  %s40_s10 = scalar_lea.hbm %s124_s0, 128 }
   0x2   :  { %s14_s7 = sshll.u32 %s88_s6, 4  ;;  %p41_p0 = scmp.ne.s32.totalorder %s124_s0, %s40_s10  ;;  %s15_s7 = int_to_ptr.vmem [resolvable:$true] %s14_s7 }
   0x3   :  { %p44_p1 = scmp.lt.u32.totalorder %s40_s10, %s124_s0 }
   0x5   :  { %p46_p2 = pnand %p44_p1, %p41_p0 }
   0x7   :  { %49 = shalt.err (!%p46_p2)
}
   0x8   :  { %s50_s15 = scalar_lea.vmem %s15_s7, 128  ;;  %p55_p4 = scmp.lt.s32.totalorder %s15_s7, %s15_s7 }
   0x9   :  { %p51_p3 = scmp.ne.s32.totalorder %s15_s7, %s50_s15  ;;  %p56_p5 = scmp.lt.s32.totalorder %s50_s15, %s50_s15 }
   0xb   :  { %p57_p6 = por %p56_p5, %p55_p4 }
   0xd   :  { %p58_p7 = pnand %p57_p6, %p51_p3 }
   0xf   :  { %61 = shalt.err (!%p58_p7)
}
  0x10   :  { %17 = dma.hbm_to_vmem [thread:$0]  %s124_s0, 128, %s15_s7, [#allocation3]  }
  0x11   :  { %84 = dma.done.wait [#allocation3], 128  }
  0x12   :  { %85 = vsyncadd [#allocation3], 4294967168  ;;  %s89_s18 = smov [#allocation5]   ;;  %v21_v0 = vld [vmem:[#allocation2] sm:$0xff] }
  0x13   :  { %s29_s19 = sshll.u32 %s89_s18, 4  ;;  %22 = vst [vmem:[#allocation5] sm:$0xff] %v21_v0  ;;  %s30_s19 = int_to_ptr.vmem [resolvable:$true] %s29_s19 }
  0x14   :  { %s62_s20 = scalar_lea.vmem %s30_s19, 128  ;;  %p67_p9 = scmp.lt.s32.totalorder %s30_s19, %s30_s19 }
  0x15   :  { %p63_p8 = scmp.ne.s32.totalorder %s30_s19, %s62_s20  ;;  %p68_p10 = scmp.lt.s32.totalorder %s62_s20, %s62_s20 }
  0x17   :  { %p69_p11 = por %p68_p10, %p67_p9 }
  0x19   :  { %p70_p12 = pnand %p69_p11, %p63_p8 }
  0x1b   :  { %73 = shalt.err (!%p70_p12)
}
  0x1c   :  { %s74_s23 = scalar_lea.hbm %s125_s1, 128 }
  0x1d   :  { %p75_p13 = scmp.ne.s32.totalorder %s125_s1, %s74_s23  ;;  %p78_p0 = scmp.lt.u32.totalorder %s74_s23, %s125_s1 }
  0x1f   :  { %p80_p1 = pnand %p78_p0, %p75_p13 }
  0x21   :  { %83 = shalt.err (!%p80_p1)
}
  0x22   :  { %32 = dma.vmem_to_hbm [thread:$0]  %s30_s19, 128, %s125_s1, [#allocation4]  }
  0x23   :  { %86 = dma.done.wait [#allocation4], 128  }
  0x24   :  { %87 = vsyncadd [#allocation4], 4294967168 }
  0x25   :  { %36 = vsyncpa [#allocation3], 1 }
  0x26   :  { %37 = vsyncpa [#allocation4], 1 }

// kernel: _forward_no_cache.1
= control target key start
LH: loop header
LB: loop body
LE: loop exit
PB: predicated region body
PF: predicated region fallthrough
CT: control target
= control target key end

     0   :  { %12 = vsyncpa [#allocation3], 0  ;;  %s550_s0 = inlined_call_operand.hbm [shape: f32[16,32], index: 0, kind: input, shape index: {}]   ;;  %s551_s1 = inlined_call_operand.hbm [shape: f32[32,16], index: 1, kind: input, shape index: {}]   ;;  %s552_s2 = inlined_call_operand.vmem [shape: f32[1,16], index: 2, kind: input, shape index: {}]   ;;  %s553_s3 = inlined_call_operand.hbm [shape: f32[16,64], index: 3, kind: input, shape index: {}]   ;;  %s554_s4 = inlined_call_operand.vmem [shape: f32[1,64], index: 4, kind: input, shape index: {}]   ;;  %s555_s5 = inlined_call_operand.hbm [shape: f32[16,16], index: 5, kind: output, shape index: {0}]   ;;  %s556_s6 = inlined_call_operand.vmem [shape: f32[16,64], index: 6, kind: output, shape index: {1}]  }
   0x1   :  { %13 = vsyncpa [#allocation6], 0 }
   0x2   :  { %14 = vsyncpa [#allocation4], 0  ;;  %s430_s21 = smov [#allocation5]   ;;  %s431_s23 = smov [#allocation2]  }
   0x3   :  { %s32_s22 = sshll.u32 %s430_s21, 4  ;;  %s20_s24 = sshll.u32 %s431_s23, 4  ;;  %s33_s22 = int_to_ptr.vmem [resolvable:$true] %s32_s22  ;;  %s471_s24 = int_to_ptr.vmem [resolvable:$true] %s20_s24 }
   0x4   :  { %s336_s27 = scalar_lea.hbm %s551_s1, 512 }
   0x5   :  { %p337_p0 = scmp.ne.s32.totalorder %s551_s1, %s336_s27  ;;  %p340_p1 = scmp.lt.u32.totalorder %s336_s27, %s551_s1 }
   0x7   :  { %p342_p2 = pnand %p340_p1, %p337_p0 }
   0x9   :  { %345 = shalt.err (!%p342_p2)
}
   0xa   :  { %s346_s8 = scalar_lea.vmem %s33_s22, 512  ;;  %p351_p4 = scmp.lt.s32.totalorder %s33_s22, %s33_s22 }
   0xb   :  { %p347_p3 = scmp.ne.s32.totalorder %s33_s22, %s346_s8  ;;  %p352_p5 = scmp.lt.s32.totalorder %s346_s8, %s346_s8 }
   0xd   :  { %p353_p6 = por %p352_p5, %p351_p4 }
   0xf   :  { %p354_p7 = pnand %p353_p6, %p347_p3 }
  0x11   :  { %357 = shalt.err (!%p354_p7)
}
  0x12   :  { %s432_s9 = smov 128   ;;  %s433_s10 = smov 8  }
  0x13   :  { %38 = dma.hbm_to_vmem [thread:$0]  %s551_s1, 512, %s33_s22, [#allocation6], %s432_s9, %s432_s9, %s433_s10  }
  0x14   :  { %s358_s15 = scalar_lea.hbm %s550_s0, 256 }
  0x15   :  { %p359_p8 = scmp.ne.s32.totalorder %s550_s0, %s358_s15  ;;  %p362_p9 = scmp.lt.u32.totalorder %s358_s15, %s550_s0 }
  0x17   :  { %p364_p10 = pnand %p362_p9, %p359_p8 }
  0x19   :  { %367 = shalt.err (!%p364_p10)
}
  0x1a   :  { %s368_s20 = scalar_lea.vmem %s471_s24, 256  ;;  %p373_p12 = scmp.lt.s32.totalorder %s471_s24, %s471_s24 }
  0x1b   :  { %p369_p11 = scmp.ne.s32.totalorder %s471_s24, %s368_s20  ;;  %p374_p13 = scmp.lt.s32.totalorder %s368_s20, %s368_s20 }
  0x1d   :  { %p375_p0 = por %p374_p13, %p373_p12 }
  0x1f   :  { %p376_p1 = pnand %p375_p0, %p369_p11 }
  0x21   :  { %379 = shalt.err (!%p376_p1)
}
  0x22   :  { %26 = dma.hbm_to_vmem [thread:$0]  %s550_s0, 256, %s471_s24, [#allocation3], %s432_s9, %s432_s9, %s433_s10  }
  0x23   :  { %s434_s22 = smov [#allocation7]   ;;  %s380_s27 = scalar_lea.hbm %s553_s3, 256 }
  0x24   :  { %s46_s23 = sshll.u32 %s434_s22, 4  ;;  %p381_p2 = scmp.ne.s32.totalorder %s553_s3, %s380_s27  ;;  %s47_s23 = int_to_ptr.vmem [resolvable:$true] %s46_s23 }
  0x25   :  { %p384_p3 = scmp.lt.u32.totalorder %s380_s27, %s553_s3 }
  0x27   :  { %p386_p4 = pnand %p384_p3, %p381_p2 }
  0x29   :  { %389 = shalt.err (!%p386_p4)
}
  0x2a   :  { %s390_s8 = scalar_lea.vmem %s47_s23, 256  ;;  %p395_p6 = scmp.lt.s32.totalorder %s47_s23, %s47_s23 }
  0x2b   :  { %p391_p5 = scmp.ne.s32.totalorder %s47_s23, %s390_s8  ;;  %p396_p7 = scmp.lt.s32.totalorder %s390_s8, %s390_s8 }
  0x2d   :  { %p397_p8 = por %p396_p7, %p395_p6 }
  0x2f   :  { %p398_p9 = pnand %p397_p8, %p391_p5 }
  0x31   :  { %401 = shalt.err (!%p398_p9)
}
  0x32   :  { %52 = dma.hbm_to_vmem [thread:$0]  %s553_s3, 256, %s47_s23, [#allocation6], %s432_s9, %s432_s9, %s433_s10  }
  0x33   :  { %424 = dma.done.wait [#allocation3], 256  }
  0x34   :  { %425 = vsyncadd [#allocation3], 4294967040 }
  0x35   :  { %426 = dma.done.wait [#allocation6], 768  }
  0x36   :  { %427 = vsyncadd [#allocation6], 4294966528  ;;  %vm81_vm0 = vcmask 261120   ;;  %v70_v0 = vld [vmem:[#allocation5] sm:$0xff]  ;;  %v71_v1 = vld [vmem:[#allocation5 + $0x8] sm:$0xff]  ;;  %vm163_vm1 = vcmask 130048  }
  0x37   :  { %v72_v2 = vld [vmem:[#allocation5 + $0x10] sm:$0xff]  ;;  %v318_v3 = vpack.c.bf16 %v71_v1, %v70_v0  ;;  %v73_v4 = vld [vmem:[#allocation5 + $0x18] sm:$0xff]  ;;  %v168_v8 = vld [vmem:[#allocation7] sm:$0xff]  ;;  %s435_s12 = smov [#allocation8]  }
  0x38   :  { %v68_v5 = vld [vmem:[#allocation2] sm:$0xff]  ;;  %v322_v6 = vpack.c.bf16 %v73_v4, %v72_v2  ;;  %v69_v7 = vld [vmem:[#allocation2 + $0x8] sm:$0xff]  ;;  %v169_v9 = vld [vmem:[#allocation7 + $0x8] sm:$0xff]  ;;  %s267_s13 = sshll.u32 %s435_s12, 4  ;;  %s268_s13 = int_to_ptr.vmem [resolvable:$true] %s267_s13 }
  0x39   :  { %308 = vmatprep.mubr.msk.f32.mxu0 %vm81_vm0, %v68_v5  ;;  %319 = vmatprep.subr.bf16.mxu0 %v318_v3  ;;  %v326_v10 = vpack.c.bf16 %v169_v9, %v168_v8  ;;  %v284_v11 = vld [vmem:[%s552_s2] ss:$0 sm:$0xff]  ;;  %s402_s14 = scalar_lea.vmem %s268_s13, 256  ;;  %p407_p11 = scmp.lt.s32.totalorder %s268_s13, %s268_s13 }
  0x3a   :  { %321 = vmatpush3.bf16.msra.mxu0 %v318_v3  ;;  %p403_p10 = scmp.ne.s32.totalorder %s268_s13, %s402_s14  ;;  %p408_p12 = scmp.lt.s32.totalorder %s402_s14, %s402_s14 }
  0x3b   :  { %323 = vmatprep.subr.bf16.mxu0 %v322_v6  ;;  %327 = vmatprep.subr.bf16.mxu1 %v326_v10 }
  0x3c   :  { %329 = vmatpush3.bf16.msra.mxu1 %v326_v10  ;;  %p409_p13 = por %p408_p12, %p407_p11 }
  0x3e   :  { %325 = vmatpush3.bf16.msra.mxu0 %v322_v6  ;;  %p410_p0 = pnand %p409_p13, %p403_p10 }
  0x41   :  { %309 = vmatmul.mubr.msk.f32.vlgmr.msra.gmra.mrb[0].mxu0 %vm81_vm0, %v69_v7 }
 0x114   :  { %v310_v12 = vpop.f32.mrb[0].mxu0 }
 0x115   :  { %v160_v13 = vadd.f32 %v310_v12, %v284_v11  ;;  %v154_v14 = vpop.f32.mrb[1].mxu0 }
 0x116   :  { %v155_v15 = vadd.f32 %v284_v11, %v154_v14 }
 0x117   :  { %165 = vst.msk [vmem:[#allocation8 + $0x8] sm:$0xff] %vm163_vm1, %v160_v13 }
 0x118   :  { %164 = vst.msk [vmem:[#allocation8] sm:$0xff] %vm163_vm1, %v155_v15 }
 0x11e   :  { %v167_v17 = vld [vmem:[#allocation8 + $0x8] sm:$0xff] }
 0x11f   :  { %v166_v16 = vld [vmem:[#allocation8] sm:$0xff] }
 0x120   :  { %315 = vmatprep.mubr.msk.f32.mxu1 %vm163_vm1, %v166_v16 }
 0x121   :  { %316 = vmatmul.mubr.msk.f32.vlgmr.msra.gmra.mrb[0].mxu1 %vm163_vm1, %v167_v17 }
 0x122   :  { %413 = shalt.err (!%p410_p0)
}
 0x123   :  { %s414_s16 = scalar_lea.hbm %s555_s5, 256 }
 0x124   :  { %p415_p1 = scmp.ne.s32.totalorder %s555_s5, %s414_s16  ;;  %p418_p2 = scmp.lt.u32.totalorder %s414_s16, %s555_s5 }
 0x126   :  { %p420_p3 = pnand %p418_p2, %p415_p1 }
 0x128   :  { %423 = shalt.err (!%p420_p3)
}
 0x129   :  { %273 = dma.vmem_to_hbm [thread:$0]  %s268_s13, 256, %s555_s5, [#allocation4], %s432_s9, %s432_s9, %s433_s10   ;;  %vm259_vm2 = vcmask 523264  }
 0x12a   :  { %v287_v18 = vld [vmem:[%s554_s4] ss:$0 sm:$0xff] }
 0x1f4   :  { %v317_v19 = vpop.f32.mrb[0].mxu1 }
 0x1f5   :  { %v256_v20 = vadd.f32 %v317_v19, %v287_v18  ;;  %v250_v21 = vpop.f32.mrb[1].mxu1 }
 0x1f6   :  { %v251_v22 = vadd.f32 %v287_v18, %v250_v21 }
 0x1f7   :  { %261 = vst.msk [vmem:[%s556_s6 + $0x8] sm:$0xff] %vm259_vm2, %v256_v20 }
 0x1f8   :  { %260 = vst.msk [vmem:[%s556_s6] sm:$0xff] %vm259_vm2, %v251_v22 }
 0x1f9   :  { %428 = dma.done.wait [#allocation4], 256  }
 0x1fa   :  { %429 = vsyncadd [#allocation4], 4294967040 }
 0x1fb   :  { %281 = vsyncpa [#allocation3], 1 }
 0x1fc   :  { %282 = vsyncpa [#allocation6], 1 }
 0x1fd   :  { %283 = vsyncpa [#allocation4], 1 }

</bundles_post_ra>
